<compile_context>
chip_gen: v6e
topology: v6e:2x2x1
jax: 0.10.0
libtpu: 0.0.40
codegen_flags: <defaults>
</compile_context>

<pallas_src>
import functools

import jax
import jax.numpy as jnp
from jax import lax
from jax.experimental import pallas as pl
from jax.experimental.pallas import tpu as pltpu


def _round_up(x, m):
    return (x + m - 1) // m * m


def _pick_tk(K):
    # Full-extent block when small (legal even if not a multiple of 128),
    # otherwise the largest multiple-of-128 divisor <= 512 (no padding for any
    # channel count in this network: 64/128/256/384/512/768/1024/1536/2048).
    if K <= 512:
        return K
    for cand in (512, 448, 384, 320, 256, 192, 128):
        if K % cand == 0:
            return cand
    return 512  # fallback: ragged tail padded


def _pick_tn(N):
    if N <= 512:
        return N if (N <= 128 or N % 128 == 0) else _round_up(N, 128)
    for cand in (512, 384, 256, 128):
        if N % cand == 0:
            return cand
    return 512  # fallback: ragged tail padded


# ----------------------------------------------------------------------------
# Pallas kernel: tiled bf16 matmul, f32 accumulator, fused epilogue
#   y = [relu]( x @ w + bias [+ residual] )
# (BN scale already folded into w; epilogue kept in f32 on the accumulator.)
# ----------------------------------------------------------------------------
def _make_kernel(apply_relu, has_residual, single_k):
    def kernel(*refs):
        if single_k:
            if has_residual:
                x_ref, w_ref, b_ref, r_ref, o_ref = refs
            else:
                x_ref, w_ref, b_ref, o_ref = refs
            y = jnp.dot(x_ref[...], w_ref[...],
                        preferred_element_type=jnp.float32) + b_ref[...]
            if has_residual:
                y = y + r_ref[...].astype(jnp.float32)
            if apply_relu:
                y = jnp.maximum(y, 0.0)
            o_ref[...] = y.astype(o_ref.dtype)
            return

        if has_residual:
            x_ref, w_ref, b_ref, r_ref, o_ref, acc_ref = refs
        else:
            x_ref, w_ref, b_ref, o_ref, acc_ref = refs
        k = pl.program_id(2)
        prod = jnp.dot(x_ref[...], w_ref[...],
                       preferred_element_type=jnp.float32)

        @pl.when(k == 0)
        def _():
            acc_ref[...] = prod          # write, don't zero-then-accumulate

        @pl.when(k != 0)
        def _():
            acc_ref[...] += prod

        @pl.when(k == pl.num_programs(2) - 1)
        def _():
            y = acc_ref[...] + b_ref[...]                 # f32 epilogue
            if has_residual:
                y = y + r_ref[...].astype(jnp.float32)
            if apply_relu:
                y = jnp.maximum(y, 0.0)
            o_ref[...] = y.astype(o_ref.dtype)            # cast at store

    return kernel


def matmul_bias(x, w, bias, residual=None, relu=False,
                out_dtype=jnp.bfloat16):
    """y = [relu]( x @ w + bias [+ residual] ) via Pallas MXU (bf16 in, f32 acc)."""
    M, K = x.shape
    K2, N = w.shape
    assert K == K2

    # Small-M (e.g. batch-2 FC / deepest stages): pallas_call launch + slicing
    # overhead exceeds the MXU work; plain XLA dot is faster there.
    if M < 128:
        y = jnp.dot(x, w, preferred_element_type=jnp.float32)
        y = y.astype(jnp.float32) + bias.astype(jnp.float32)
        if residual is not None:
            y = y + residual.astype(jnp.float32)
        if relu:
            y = jnp.maximum(y, 0.0)
        return y.astype(out_dtype)

    # Tile sizes: divisors of K/N (no padding), bf16 rows rounded to 16.
    # Double-buffered working set at the max (256, 512, 512) tiles is ~3 MiB:
    # safe on v5e (16 MiB scoped default), v6e, and v7x (64 MiB physical).
    tm = 256 if M >= 256 else _round_up(M, 16)
    tn = _pick_tn(N)
    tk = _pick_tk(K)
    Mp, Np = _round_up(M, tm), _round_up(N, tn)

    # v7x megacore: make sure the parallel axes have >= 2 blocks so both
    # TensorCores get work (v5e/v6e: one extra ~0.35us grid step, negligible).
    if (Mp // tm) * (Np // tn) < 2:
        if tn % 256 == 0:
            tn //= 2
        elif tm % 32 == 0:
            tm //= 2
        Mp, Np = _round_up(M, tm), _round_up(N, tn)
    Kp = _round_up(K, tk)

    xp = x if x.dtype == jnp.bfloat16 else x.astype(jnp.bfloat16)
    if (Mp, Kp) != (M, K):
        xp = jnp.pad(xp, ((0, Mp - M), (0, Kp - K)))   # ragged tail only
    # Weights are pre-folded / pre-concatenated / pre-cast to bf16 at init and
    # tk/tn divide K/N for every conv in this network, so these pads never run.
    wp = w if w.dtype == jnp.bfloat16 else w.astype(jnp.bfloat16)
    if (Kp, Np) != (K, N):
        wp = jnp.pad(wp, ((0, Kp - K), (0, Np - N)))
    bp = bias.astype(jnp.float32).reshape(1, N)
    if Np != N:
        bp = jnp.pad(bp, ((0, 0), (0, Np - N)))

    has_res = residual is not None
    operands = [xp, wp, bp]
    in_specs = [
        pl.BlockSpec((tm, tk), lambda i, j, k: (i, k)),
        pl.BlockSpec((tk, tn), lambda i, j, k: (k, j)),
        pl.BlockSpec((1, tn), lambda i, j, k: (0, j)),
    ]
    if has_res:
        rp = residual if residual.dtype == jnp.bfloat16 else residual.astype(jnp.bfloat16)
        if (Mp, Np) != (M, N):
            rp = jnp.pad(rp, ((0, Mp - M), (0, Np - N)))
        operands.append(rp)
        in_specs.append(pl.BlockSpec((tm, tn), lambda i, j, k: (i, j)))

    nk = Kp // tk
    single_k = nk == 1
    kernel = _make_kernel(relu, has_res, single_k)
    scratch = [] if single_k else [pltpu.VMEM((tm, tn), jnp.float32)]
    out = pl.pallas_call(
        kernel,
        out_shape=jax.ShapeDtypeStruct((Mp, Np), out_dtype),
        grid_spec=pltpu.PrefetchScalarGridSpec(
            num_scalar_prefetch=0,
            grid=(Mp // tm, Np // tn, nk),
            in_specs=in_specs,
            out_specs=pl.BlockSpec((tm, tn), lambda i, j, k: (i, j)),
            scratch_shapes=scratch,
        ),
        compiler_params=pltpu.CompilerParams(
            dimension_semantics=("parallel", "parallel", "arbitrary")),
    )(*operands)
    if (Mp, Np) != (M, N):
        out = out[:M, :N]
    return out


# ----------------------------------------------------------------------------
# Conv helpers (NHWC, bf16 activations)
# ----------------------------------------------------------------------------
def conv1x1_bn(x, w, bias, stride=1, relu=True, residual=None):
    """1x1 conv (+folded BN) [+ residual] [+ ReLU] via the Pallas matmul."""
    if stride > 1:
        x = x[:, ::stride, ::stride, :]
    n, h, w_, c = x.shape
    cout = w.shape[1]
    x2 = x.reshape(n * h * w_, c)
    r2 = residual.reshape(n * h * w_, cout) if residual is not None else None
    y = matmul_bias(x2, w, bias, residual=r2, relu=relu,
                    out_dtype=jnp.bfloat16)
    return y.reshape(n, h, w_, cout)


def conv_spatial_bn(x, w_hwio, bias, stride, pad, relu=True):
    # TODO(synk): spatial (7x7 stem / 3x3) convs use lax.conv_general_dilated
    # rather than a Pallas implicit-GEMM kernel; this avoids the 9x/49x im2col
    # HBM blow-up that a naive Pallas path would pay.
    y = lax.conv_general_dilated(
        x, w_hwio,
        window_strides=(stride, stride),
        padding=((pad, pad), (pad, pad)),
        dimension_numbers=('NHWC', 'HWIO', 'NHWC'),
        preferred_element_type=jnp.float32)
    y = y + bias.astype(jnp.float32)
    if relu:
        y = jnp.maximum(y, 0.0)
    return y.astype(jnp.bfloat16)


def _maxpool(x, k=3, stride=2, pad=1):
    # PyTorch MaxPool2d(3, 2, 1): -inf padding never wins; one reduce_window
    # pass instead of 9 full-tensor maximum reads.
    return lax.reduce_window(
        x, jnp.array(-jnp.inf, x.dtype), lax.max,
        window_dimensions=(1, k, k, 1),
        window_strides=(1, stride, stride, 1),
        padding=((0, 0), (pad, pad), (pad, pad), (0, 0)))


# ----------------------------------------------------------------------------
# Parameter init: BN folded, scale pre-multiplied into bf16 weights; for the
# first block of each stage the downsample 1x1 is pre-concatenated with conv3
# along K so the whole (conv3 + bn3 + downsample + bn_d) is a single matmul.
# TODO(synk): BatchNorm is inference-mode only (folded running stats);
# training-mode batch statistics are not computed in-kernel.
# ----------------------------------------------------------------------------
def _bn_fold(key, c, eps=1e-5):
    k1, k2, k3, k4 = jax.random.split(key, 4)
    gamma = 1.0 + 0.1 * jax.random.normal(k1, (c,), jnp.float32)
    beta = 0.1 * jax.random.normal(k2, (c,), jnp.float32)
    mean = 0.1 * jax.random.normal(k3, (c,), jnp.float32)
    var = 1.0 + 0.1 * jax.random.uniform(k4, (c,), jnp.float32)
    scale = gamma / jnp.sqrt(var + eps)
    bias = beta - mean * scale
    return scale, bias


def init_params(key, layers, image_channels, num_classes):
    keys = iter(jax.random.split(key, 512))

    def conv_w_oihw(cout, cin, kh, kw):
        std = (2.0 / (cin * kh * kw)) ** 0.5
        return std * jax.random.normal(next(keys), (cout, cin, kh, kw),
                                       jnp.float32)

    def fold_1x1(cout, cin):
        w = conv_w_oihw(cout, cin, 1, 1)[:, :, 0, 0]          # (cout, cin)
        scale, bias = _bn_fold(next(keys), cout)
        wf = (w * scale[:, None]).T                            # (cin, cout)
        return wf.astype(jnp.bfloat16), bias

    def fold_spatial(cout, cin, kh, kw):
        w = conv_w_oihw(cout, cin, kh, kw)                     # OIHW
        scale, bias = _bn_fold(next(keys), cout)
        wf = jnp.transpose(w * scale[:, None, None, None], (2, 3, 1, 0))  # HWIO
        return wf.astype(jnp.bfloat16), bias

    params = {}
    params['conv1_w'], params['conv1_b'] = fold_spatial(64, image_channels, 7, 7)
    params['layers'] = []
    in_channels = 64
    for li, (num_layer, inter) in enumerate(zip(layers, [64, 128, 256, 512])):
        stride = 1 if li == 0 else 2
        blocks = []
        # first block always has identity_downsample (as in the reference code)
        w1, b1 = fold_1x1(inter, in_channels)
        w2, b2 = fold_spatial(inter, inter, 3, 3)
        w3, b3 = fold_1x1(inter * 4, inter)
        wd, bd = fold_1x1(inter * 4, in_channels)
        # Fused conv3 + downsample: [out2, x_strided] @ [[w3],[wd]] + (b3+bd)
        w3d = jnp.concatenate([w3, wd], axis=0)                # (inter+in_ch, 4*inter)
        b3d = b3 + bd
        blocks.append(dict(w1=w1, b1=b1, w2=w2, b2=b2,
                           w3=None, b3=None, w3d=w3d, b3d=b3d, stride=stride))
        in_channels = inter * 4
        for _ in range(num_layer - 1):
            w1, b1 = fold_1x1(inter, in_channels)
            w2, b2 = fold_spatial(inter, inter, 3, 3)
            w3, b3 = fold_1x1(inter * 4, inter)
            blocks.append(dict(w1=w1, b1=b1, w2=w2, b2=b2, w3=w3, b3=b3,
                               w3d=None, b3d=None, stride=1))
        params['layers'].append(blocks)
    kw_, kb_ = jax.random.split(next(keys))
    params['fc_w'] = 0.01 * jax.random.normal(kw_, (512 * 4, num_classes),
                                              jnp.float32)   # pre-transposed
    params['fc_b'] = 0.01 * jax.random.normal(kb_, (num_classes,), jnp.float32)
    return params


# ----------------------------------------------------------------------------
# Forward
# ----------------------------------------------------------------------------
def _bottleneck(x, blk):
    out = conv1x1_bn(x, blk['w1'], blk['b1'], stride=1, relu=True)
    out = conv_spatial_bn(out, blk['w2'], blk['b2'], stride=blk['stride'],
                          pad=1, relu=True)
    n, h, w_, c = out.shape
    if blk['w3d'] is not None:
        # First block of the stage: conv3 + bn3 + downsample + bn_d + ReLU
        # fused into ONE Pallas matmul via K-concatenation (no identity HBM
        # round-trip, one epilogue).
        s = blk['stride']
        xs = x[:, ::s, ::s, :] if s > 1 else x
        x_cat = jnp.concatenate(
            [out.reshape(n * h * w_, c),
             xs.reshape(n * h * w_, xs.shape[-1])], axis=-1)
        y = matmul_bias(x_cat, blk['w3d'], blk['b3d'], relu=True,
                        out_dtype=jnp.bfloat16)
        return y.reshape(n, h, w_, -1)
    # No downsample: conv3 -> bn3 -> (+identity) -> relu fused in the epilogue.
    return conv1x1_bn(out, blk['w3'], blk['b3'], stride=1, relu=True,
                      residual=x)


def resnet_forward(params, x_nchw):
    x = jnp.transpose(x_nchw, (0, 2, 3, 1)).astype(jnp.bfloat16)  # NCHW->NHWC
    x = conv_spatial_bn(x, params['conv1_w'], params['conv1_b'],
                        stride=2, pad=3, relu=True)
    x = _maxpool(x, 3, 2, 1)
    for blocks in params['layers']:
        for blk in blocks:
            x = _bottleneck(x, blk)
    x = jnp.mean(x.astype(jnp.float32), axis=(1, 2))   # AdaptiveAvgPool2d((1,1))
    # FC: logits kept in f32; tiny-M batches take the non-Pallas path inside.
    y = matmul_bias(x, params['fc_w'], params['fc_b'], relu=False,
                    out_dtype=jnp.float32)
    return y


if __name__ == "__main__":
    key = jax.random.PRNGKey(0)
    pkey, xkey = jax.random.split(key)
    layers = [1, 1, 1, 1]          # small bottleneck stack (ResNet-style)
    image_channels = 3
    num_classes = 10
    params = init_params(pkey, layers, image_channels, num_classes)
    x = jax.random.normal(xkey, (2, image_channels, 32, 32), jnp.float32)

    fwd = jax.jit(functools.partial(resnet_forward, params))
    out = jax.block_until_ready(fwd(x))
    assert out.shape == (2, num_classes)
    assert jnp.all(jnp.isfinite(out))
    print("KERNEL_OK")
</pallas_src>

<mosaic_0001>
module attributes {stable_mosaic.version = 11 : i64} {
  func.func @kernel(%arg0: i32, %arg1: i32, %arg2: i32, %arg3: memref<64x64xbf16, #tpu.memory_space<vmem>>, %arg4: memref<64x64xbf16, #tpu.memory_space<vmem>>, %arg5: memref<1x64xf32, #tpu.memory_space<vmem>>, %arg6: memref<64x64xbf16, #tpu.memory_space<vmem>>) attributes {dimension_semantics = [#tpu.dimension_semantics<parallel>, #tpu.dimension_semantics<parallel>, #tpu.dimension_semantics<arbitrary>], iteration_bounds = array<i64: 2, 1, 1>, scalar_prefetch = 0 : i64, scratch_operands = 0 : i64, tpu.core_type = #tpu.core_type<tc>, window_params = [{transform_indices = @transform_0, window_bounds = array<i64: 64, 64>}, {transform_indices = @transform_1, window_bounds = array<i64: 64, 64>}, {transform_indices = @transform_2, window_bounds = array<i64: 1, 64>}, {transform_indices = @transform_3, window_bounds = array<i64: 64, 64>}]} {
    %c0 = arith.constant 0 : index
    %c0_0 = arith.constant 0 : index
    %0 = vector.load %arg3[%c0, %c0_0] : memref<64x64xbf16, #tpu.memory_space<vmem>>, vector<64x64xbf16>
    %c0_1 = arith.constant 0 : index
    %c0_2 = arith.constant 0 : index
    %1 = vector.load %arg4[%c0_1, %c0_2] : memref<64x64xbf16, #tpu.memory_space<vmem>>, vector<64x64xbf16>
    %cst = arith.constant dense<0.000000e+00> : vector<64x64xf32>
    %2 = tpu.matmul %0, %1, %cst {dimension_numbers = #tpu.dot_dimension_numbers<[1], [0], [0], [1], [0, 0, 1, 1], [], []>} : vector<64x64xbf16>, vector<64x64xbf16>, vector<64x64xf32> -> vector<64x64xf32>
    %c0_3 = arith.constant 0 : index
    %c0_4 = arith.constant 0 : index
    %3 = vector.load %arg5[%c0_3, %c0_4] : memref<1x64xf32, #tpu.memory_space<vmem>>, vector<1x64xf32>
    %4 = vector.broadcast %3 : vector<1x64xf32> to vector<64x64xf32>
    %5 = arith.addf %2, %4 : vector<64x64xf32>
    %cst_5 = arith.constant 0.000000e+00 : f32
    %6 = vector.broadcast %cst_5 : f32 to vector<64x64xf32>
    %7 = arith.maximumf %5, %6 : vector<64x64xf32>
    %8 = arith.truncf %7 : vector<64x64xf32> to vector<64x64xbf16>
    %c0_6 = arith.constant 0 : index
    %c0_7 = arith.constant 0 : index
    %9 = vector.load %arg6[%c0_6, %c0_7] : memref<64x64xbf16, #tpu.memory_space<vmem>>, vector<64x64xbf16>
    tpu.vector_store %arg6[%c0_6, %c0_7], %8 {strides = array<i32>} : memref<64x64xbf16, #tpu.memory_space<vmem>>, vector<64x64xbf16>,
    return
  }
  func.func @transform_0(%arg0: i32, %arg1: i32, %arg2: i32) -> (i32, i32) {
    %c0_i32 = arith.constant 0 : i32
    return %arg0, %arg2 : i32, i32
  }
  func.func @transform_1(%arg0: i32, %arg1: i32, %arg2: i32) -> (i32, i32) {
    %c0_i32 = arith.constant 0 : i32
    return %arg2, %arg1 : i32, i32
  }
  func.func @transform_2(%arg0: i32, %arg1: i32, %arg2: i32) -> (i32, i32) {
    %c0_i32 = arith.constant 0 : i32
    %c0_i32_0 = arith.constant 0 : i32
    return %c0_i32, %arg1 : i32, i32
  }
  func.func @transform_3(%arg0: i32, %arg1: i32, %arg2: i32) -> (i32, i32) {
    %c0_i32 = arith.constant 0 : i32
    return %arg0, %arg1 : i32, i32
  }
}

module attributes {stable_mosaic.version = 11 : i64} {
  func.func @kernel(%arg0: i32, %arg1: i32, %arg2: i32, %arg3: memref<128x128xbf16, #tpu.memory_space<vmem>>, %arg4: memref<128x128xbf16, #tpu.memory_space<vmem>>, %arg5: memref<1x128xf32, #tpu.memory_space<vmem>>, %arg6: memref<128x128xbf16, #tpu.memory_space<vmem>>) attributes {dimension_semantics = [#tpu.dimension_semantics<parallel>, #tpu.dimension_semantics<parallel>, #tpu.dimension_semantics<arbitrary>], iteration_bounds = array<i64: 1, 2, 1>, scalar_prefetch = 0 : i64, scratch_operands = 0 : i64, tpu.core_type = #tpu.core_type<tc>, window_params = [{transform_indices = @transform_0, window_bounds = array<i64: 128, 128>}, {transform_indices = @transform_1, window_bounds = array<i64: 128, 128>}, {transform_indices = @transform_2, window_bounds = array<i64: 1, 128>}, {transform_indices = @transform_3, window_bounds = array<i64: 128, 128>}]} {
    %c0 = arith.constant 0 : index
    %c0_0 = arith.constant 0 : index
    %0 = vector.load %arg3[%c0, %c0_0] : memref<128x128xbf16, #tpu.memory_space<vmem>>, vector<128x128xbf16>
    %c0_1 = arith.constant 0 : index
    %c0_2 = arith.constant 0 : index
    %1 = vector.load %arg4[%c0_1, %c0_2] : memref<128x128xbf16, #tpu.memory_space<vmem>>, vector<128x128xbf16>
    %cst = arith.constant dense<0.000000e+00> : vector<128x128xf32>
    %2 = tpu.matmul %0, %1, %cst {dimension_numbers = #tpu.dot_dimension_numbers<[1], [0], [0], [1], [0, 0, 1, 1], [], []>} : vector<128x128xbf16>, vector<128x128xbf16>, vector<128x128xf32> -> vector<128x128xf32>
    %c0_3 = arith.constant 0 : index
    %c0_4 = arith.constant 0 : index
    %3 = vector.load %arg5[%c0_3, %c0_4] : memref<1x128xf32, #tpu.memory_space<vmem>>, vector<1x128xf32>
    %4 = vector.broadcast %3 : vector<1x128xf32> to vector<128x128xf32>
    %5 = arith.addf %2, %4 : vector<128x128xf32>
    %cst_5 = arith.constant 0.000000e+00 : f32
    %6 = vector.broadcast %cst_5 : f32 to vector<128x128xf32>
    %7 = arith.maximumf %5, %6 : vector<128x128xf32>
    %8 = arith.truncf %7 : vector<128x128xf32> to vector<128x128xbf16>
    %c0_6 = arith.constant 0 : index
    %c0_7 = arith.constant 0 : index
    %9 = vector.load %arg6[%c0_6, %c0_7] : memref<128x128xbf16, #tpu.memory_space<vmem>>, vector<128x128xbf16>
    tpu.vector_store %arg6[%c0_6, %c0_7], %8 {strides = array<i32>} : memref<128x128xbf16, #tpu.memory_space<vmem>>, vector<128x128xbf16>,
    return
  }
  func.func @transform_0(%arg0: i32, %arg1: i32, %arg2: i32) -> (i32, i32) {
    %c0_i32 = arith.constant 0 : i32
    return %arg0, %arg2 : i32, i32
  }
  func.func @transform_1(%arg0: i32, %arg1: i32, %arg2: i32) -> (i32, i32) {
    %c0_i32 = arith.constant 0 : i32
    return %arg2, %arg1 : i32, i32
  }
  func.func @transform_2(%arg0: i32, %arg1: i32, %arg2: i32) -> (i32, i32) {
    %c0_i32 = arith.constant 0 : i32
    %c0_i32_0 = arith.constant 0 : i32
    return %c0_i32, %arg1 : i32, i32
  }
  func.func @transform_3(%arg0: i32, %arg1: i32, %arg2: i32) -> (i32, i32) {
    %c0_i32 = arith.constant 0 : i32
    return %arg0, %arg1 : i32, i32
  }
}

module attributes {stable_mosaic.version = 11 : i64} {
  func.func @kernel(%arg0: i32, %arg1: i32, %arg2: i32, %arg3: memref<64x256xbf16, #tpu.memory_space<vmem>>, %arg4: memref<256x128xbf16, #tpu.memory_space<vmem>>, %arg5: memref<1x128xf32, #tpu.memory_space<vmem>>, %arg6: memref<64x128xbf16, #tpu.memory_space<vmem>>) attributes {dimension_semantics = [#tpu.dimension_semantics<parallel>, #tpu.dimension_semantics<parallel>, #tpu.dimension_semantics<arbitrary>], iteration_bounds = array<i64: 2, 1, 1>, scalar_prefetch = 0 : i64, scratch_operands = 0 : i64, tpu.core_type = #tpu.core_type<tc>, window_params = [{transform_indices = @transform_0, window_bounds = array<i64: 64, 256>}, {transform_indices = @transform_1, window_bounds = array<i64: 256, 128>}, {transform_indices = @transform_2, window_bounds = array<i64: 1, 128>}, {transform_indices = @transform_3, window_bounds = array<i64: 64, 128>}]} {
    %c0 = arith.constant 0 : index
    %c0_0 = arith.constant 0 : index
    %0 = vector.load %arg3[%c0, %c0_0] : memref<64x256xbf16, #tpu.memory_space<vmem>>, vector<64x256xbf16>
    %c0_1 = arith.constant 0 : index
    %c0_2 = arith.constant 0 : index
    %1 = vector.load %arg4[%c0_1, %c0_2] : memref<256x128xbf16, #tpu.memory_space<vmem>>, vector<256x128xbf16>
    %cst = arith.constant dense<0.000000e+00> : vector<64x128xf32>
    %2 = tpu.matmul %0, %1, %cst {dimension_numbers = #tpu.dot_dimension_numbers<[1], [0], [0], [1], [0, 0, 1, 1], [], []>} : vector<64x256xbf16>, vector<256x128xbf16>, vector<64x128xf32> -> vector<64x128xf32>
    %c0_3 = arith.constant 0 : index
    %c0_4 = arith.constant 0 : index
    %3 = vector.load %arg5[%c0_3, %c0_4] : memref<1x128xf32, #tpu.memory_space<vmem>>, vector<1x128xf32>
    %4 = vector.broadcast %3 : vector<1x128xf32> to vector<64x128xf32>
    %5 = arith.addf %2, %4 : vector<64x128xf32>
    %cst_5 = arith.constant 0.000000e+00 : f32
    %6 = vector.broadcast %cst_5 : f32 to vector<64x128xf32>
    %7 = arith.maximumf %5, %6 : vector<64x128xf32>
    %8 = arith.truncf %7 : vector<64x128xf32> to vector<64x128xbf16>
    %c0_6 = arith.constant 0 : index
    %c0_7 = arith.constant 0 : index
    %9 = vector.load %arg6[%c0_6, %c0_7] : memref<64x128xbf16, #tpu.memory_space<vmem>>, vector<64x128xbf16>
    tpu.vector_store %arg6[%c0_6, %c0_7], %8 {strides = array<i32>} : memref<64x128xbf16, #tpu.memory_space<vmem>>, vector<64x128xbf16>,
    return
  }
  func.func @transform_0(%arg0: i32, %arg1: i32, %arg2: i32) -> (i32, i32) {
    %c0_i32 = arith.constant 0 : i32
    return %arg0, %arg2 : i32, i32
  }
  func.func @transform_1(%arg0: i32, %arg1: i32, %arg2: i32) -> (i32, i32) {
    %c0_i32 = arith.constant 0 : i32
    return %arg2, %arg1 : i32, i32
  }
  func.func @transform_2(%arg0: i32, %arg1: i32, %arg2: i32) -> (i32, i32) {
    %c0_i32 = arith.constant 0 : i32
    %c0_i32_0 = arith.constant 0 : i32
    return %c0_i32, %arg1 : i32, i32
  }
  func.func @transform_3(%arg0: i32, %arg1: i32, %arg2: i32) -> (i32, i32) {
    %c0_i32 = arith.constant 0 : i32
    return %arg0, %arg1 : i32, i32
  }
}

</mosaic_0001>

<bundles_post_ra>
// kernel: resnet_forward.3
= control target key start
LH: loop header
LB: loop body
LE: loop exit
PB: predicated region body
PF: predicated region fallthrough
CT: control target
= control target key end

     0   :  { %8 = vsyncpa [#allocation3], 0  ;;  %s912_s0 = inlined_call_operand.vmem [shape: bf16[128,64], index: 0, kind: input, shape index: {}]   ;;  %s913_s1 = inlined_call_operand.hbm [shape: bf16[64,64], index: 1, kind: input, shape index: {}]   ;;  %s914_s2 = inlined_call_operand.hbm [shape: f32[1,64], index: 2, kind: input, shape index: {}]   ;;  %s915_s3 = inlined_call_operand.vmem [shape: bf16[128,64], index: 3, kind: output, shape index: {}]  }
   0x1   :  { %9 = vsyncpa [#allocation5], 0  ;;  %s802_s12 = smov 0   ;;  %s804_s13 = smov 0  }
   0x2   :  { %s806_s14 = smov 0  }
   0x3 LB: > { %s563_s15 = sadd.s32 4294967295, %s776_s14   ;;  %s34_s16 = sadd.s32 1, %s772_s13  ;;  %s776_s14 = sphi %s806_s14, %s15_s14   ;;  %s772_s13 = sphi %s804_s13, %s920_s13   ;;  %s768_s12 = sphi %s802_s12, %s919_s12  }
   0x4   : > { %p36_p0 = scmp.ge.s32.totalorder %s34_s16, 2  ;;  %p565_p1 = scmp.ge.s32.totalorder %s776_s14, 1 }
   0x5   : > { %p149_p2 = scmp.lt.s32.totalorder %s776_s14, 3  ;;  %p827_p4 = scmp.eq.s32.totalorder %s563_s15, 0 }
   0x6   : > { %s922_s16 = smov (%p36_p0, %s34_s16), 0  ;;  %s778_s19 = smov [#allocation2]  }
   0x7   : > { %p823_p3 = pnand %p565_p1, %p149_p2  ;;  %s165_s20 = sshll.u32 %s778_s19, 4  ;;  %s166_s20 = int_to_ptr.vmem [resolvable:$true] %s165_s20 }
   0x8   : > { %s779_s22 = smov [#allocation4]   ;;  %s705_s24 = scalar_lea.vmem %s166_s20, 512 }
   0x9   : > { %p647_p5 = pneg %p823_p3  ;;  %s181_s23 = sshll.u32 %s779_s22, 4  ;;  %s182_s23 = int_to_ptr.vmem [resolvable:$true] %s181_s23 }
   0xa   : > { %p706_p8 = scmp.ne.s32.totalorder %s166_s20, %s705_s24  ;;  %p713_p11 = scmp.lt.s32.totalorder %s166_s20, %s166_s20 }
   0xb   : > { %p835_p6 = pnand %p827_p4, %p647_p5  ;;  %p714_p12 = scmp.lt.s32.totalorder %s705_s24, %s705_s24 }
   0xd   : > { %p696_p7 = pneg %p835_p6  ;;  %p715_p13 = por %p714_p12, %p713_p11 }
   0xf   : > { %p708_p9 = pnand %p706_p8, %p696_p7 }
  0x11   : > { %p709_p10 = pneg %p708_p9 }
  0x13   : > { %p716_p0 = pnand %p715_p13, %p709_p10 }
  0x15   : > { %719 = shalt.err (!%p716_p0)
}
  0x16   : > { %s780_s25 = smov 64   ;;  %s781_s26 = smov 4  }
  0x17   : > { %650 = dma.hbm_to_vmem [thread:$0]  (!%p835_p6), %s913_s1, 512, %s166_s20, [#allocation3], %s780_s25, %s780_s25, %s781_s26  }
  0x18   : > { %s731_s29 = scalar_lea.vmem %s182_s23, 16  ;;  %s738_s30 = scalar_lea.vmem %s182_s23, 32 }
  0x19   : > { %p732_p1 = scmp.ne.s32.totalorder %s182_s23, %s731_s29  ;;  %p739_p8 = scmp.lt.s32.totalorder %s182_s23, %s182_s23 }
  0x1a   : > { %p740_p9 = scmp.lt.s32.totalorder %s738_s30, %s731_s29 }
  0x1b   : > { %p734_p2 = pnand %p732_p1, %p696_p7 }
  0x1c   : > { %p741_p10 = por %p740_p9, %p739_p8 }
  0x1d   : > { %p735_p5 = pneg %p734_p2 }
  0x1f   : > { %p742_p11 = pnand %p741_p10, %p735_p5 }
  0x21   : > { %745 = shalt.err (!%p742_p11)
}
  0x22   : > { %653 = dma.hbm_to_vmem [thread:$0]  (!%p835_p6), %s914_s2, 16, %s182_s23, [#allocation5]  }
  0x23   : > { %206 = sbr.rel (%p823_p3) target bundleno = 267 (0x10b), region = 32 }
  0x28   : > { %759 = dma.done.wait (%p827_p4), [#allocation3], 512  }
  0x29   : > { %761 = vsyncadd (%p827_p4), [#allocation3], 4294966784 }
  0x2a   : > { %763 = dma.done.wait (%p827_p4), [#allocation5], 16  }
  0x2b   : > { %765 = vsyncadd (%p827_p4), [#allocation5], 4294967280  ;;  %s572_s6 = sshll.u32 %s768_s12, 3  ;;  %v686_v0 = vld [vmem:[#allocation2 + $0x18] sm:$0xff]   ;;  %v687_v1 = vld [vmem:[#allocation2 + $0x10] sm:$0xff]   ;;  %vm327_vm0 = vcmask 523264  }
  0x2c   : > { %p241_p7 = scmp.lt.s32.totalorder %s572_s6, 15  ;;  %615 = vmatprep.subr.bf16.mxu0 %v686_v0  ;;  %631 = vmatprep.subr.bf16.mxu1 %v686_v0  ;;  %v688_v2 = vld [vmem:[#allocation2 + $0x8] sm:$0xff]   ;;  %v689_v5 = vld [vmem:[#allocation2] sm:$0xff]   ;;  %vm445_vm1 = vcmask 519168  }
  0x2d   : > { %616 = vmatpush3.bf16.msra.mxu0 %v686_v0  ;;  %635 = vmatpush3.bf16.msra.mxu1 %v686_v0  ;;  %v576_v8 = vld [vmem:[#allocation4] ss:$0 sm:$0xff] }
  0x2e   : > { %s924_s6 = smov (!%p241_p7, %s572_s6), 15  ;;  %617 = vmatprep.subr.bf16.mxu0 %v687_v1  ;;  %632 = vmatprep.subr.bf16.mxu1 %v687_v1 }
  0x2f   : > { %s573_s7 = sshll.u32 %s924_s6, 2 }
  0x30   : > { %s247_s10 = scalar_lea.vmem %s912_s0, %s573_s7  ;;  %s885_s15 = scalar_lea.vmem %s915_s3, %s573_s7 }
  0x31   : > { %v690_v3 = vld [vmem:[%s247_s10] sm:$0xff]   ;;  %v691_v4 = vld [vmem:[%s247_s10 + $0x10] sm:$0xff]   ;;  %618 = vmatpush3.bf16.msra.mxu0 %v687_v1  ;;  %636 = vmatpush3.bf16.msra.mxu1 %v687_v1  ;;  %v692_v6 = vld [vmem:[%s247_s10 + $0x8] sm:$0xff]  }
  0x32   : > { %623 = vmatprep.mubr.msk.bf16.mxu0 %vm327_vm0, %v690_v3  ;;  %619 = vmatprep.subr.bf16.mxu0 %v688_v2  ;;  %v693_v7 = vld [vmem:[%s247_s10 + $0x18] sm:$0xff]  }
  0x33   : > { %633 = vmatprep.subr.bf16.mxu1 %v688_v2  ;;  %627 = vmatprep.mubr.msk.bf16.mxu1 %vm327_vm0, %v691_v4 }
  0x35   : > { %620 = vmatpush3.bf16.msra.mxu0 %v688_v2  ;;  %637 = vmatpush3.bf16.msra.mxu1 %v688_v2 }
  0x36   : > { %621 = vmatprep.subr.bf16.mxu0 %v689_v5  ;;  %634 = vmatprep.subr.bf16.mxu1 %v689_v5 }
  0x39   : > { %622 = vmatpush3.bf16.msra.mxu0 %v689_v5  ;;  %638 = vmatpush3.bf16.msra.mxu1 %v689_v5 }
  0x3c   : > { %624 = vmatmul.mubr.msk.bf16.vlgmr.msra.gmra.mxu0 %vm327_vm0, %v692_v6  ;;  %628 = vmatmul.mubr.msk.bf16.vlgmr.msra.gmra.mxu1 %vm327_vm0, %v693_v7 }
  0xfc   : > { %v625_v9 = vpop.f32.mrf.mxu0  ;;  %v629_v10 = vpop.f32.mrf.mxu1 }
  0xfd   : > { %v383_v11 = vadd.f32 %v625_v9, %v576_v8  ;;  %v399_v12 = vadd.f32 %v629_v10, %v576_v8 }
  0xfe   : > { %v374_v13 = vpop.f32.mrf.mxu0  ;;  %v390_v14 = vpop.f32.mrf.mxu1 }
  0xff   : > { %v407_v15 = vmax.f32 %v383_v11, 0.0  ;;  %v411_v16 = vmax.f32 %v399_v12, 0.0  ;;  %v375_v17 = vadd.f32 %v576_v8, %v374_v13  ;;  %v391_v18 = vadd.f32 %v576_v8, %v390_v14 }
 0x100   : > { %v626_v19 = vpop.f32.mrf.mxu0  ;;  %v630_v20 = vpop.f32.mrf.mxu1 }
 0x101   : > { %v601_v21 = vpack.c.bf16 %v407_v15, %v407_v15  ;;  %v605_v22 = vpack.c.bf16 %v411_v16, %v411_v16  ;;  %v405_v23 = vmax.f32 %v375_v17, 0.0  ;;  %v409_v24 = vmax.f32 %v391_v18, 0.0 }
 0x102   : > { %v386_v25 = vadd.f32 %v626_v19, %v576_v8  ;;  %v402_v26 = vadd.f32 %v630_v20, %v576_v8  ;;  %v377_v27 = vpop.f32.mrf.mxu0  ;;  %v393_v28 = vpop.f32.mrf.mxu1 }
 0x103   : > { %448 = vst.msk [vmem:[%s885_s15 + $0x8] sm:$0xf] %vm445_vm1, %v601_v21  ;;  %452 = vst.msk [vmem:[%s885_s15 + $0x18] sm:$0xf] %vm445_vm1, %v605_v22  ;;  %v599_v29 = vpack.c.bf16 %v405_v23, %v405_v23  ;;  %v603_v30 = vpack.c.bf16 %v409_v24, %v409_v24  ;;  %v378_v31 = vadd.f32 %v576_v8, %v377_v27 }
 0x104   : > { %v394_v32 = vadd.f32 %v576_v8, %v393_v28  ;;  %v408_v33 = vmax.f32 %v386_v25, 0.0  ;;  %v412_v34 = vmax.f32 %v402_v26, 0.0 }
 0x105   : > { %446 = vst.msk [vmem:[%s885_s15] sm:$0xf] %vm445_vm1, %v599_v29  ;;  %450 = vst.msk [vmem:[%s885_s15 + $0x10] sm:$0xf] %vm445_vm1, %v603_v30  ;;  %v406_v35 = vmax.f32 %v378_v31, 0.0 }
 0x106   : > { %v410_v36 = vmax.f32 %v394_v32, 0.0  ;;  %v602_v37 = vpack.c.bf16 %v408_v33, %v408_v33  ;;  %v606_v38 = vpack.c.bf16 %v412_v34, %v412_v34 }
 0x107   : > { %v600_v39 = vpack.c.bf16 %v406_v35, %v406_v35 }
 0x108   : > { %v604_v40 = vpack.c.bf16 %v410_v36, %v410_v36  ;;  %449 = vst.msk [vmem:[%s885_s15 + $0xc] sm:$0xf] %vm445_vm1, %v602_v37  ;;  %453 = vst.msk [vmem:[%s885_s15 + $0x1c] sm:$0xf] %vm445_vm1, %v606_v38 }
 0x109   : > { %447 = vst.msk [vmem:[%s885_s15 + $0x4] sm:$0xf] %vm445_vm1, %v600_v39 }
 0x10a   : > { %451 = vst.msk [vmem:[%s885_s15 + $0x14] sm:$0xf] %vm445_vm1, %v604_v40 }
 0x10b PF: > { %s15_s14 = sadd.s32 1, %s776_s14   ;;  %s919_s12 = smov %s772_s13 }
 0x10c   : > { %p12_p3 = scmp.ge.s32.totalorder %s15_s14, 4   ;;  %s920_s13 = smov %s922_s16 }
 0x10e   :  { %14 = sbr.rel (!%p12_p3) target bundleno = 3 (0x3), region = 73 }
 0x113   :  { %482 = vsyncpa [#allocation3], 1 }
 0x114   :  { %484 = vsyncpa [#allocation3 + $0x1], 1 }
 0x115   :  { %485 = vsyncpa [#allocation5], 1 }

// kernel: resnet_forward.4
= control target key start
LH: loop header
LB: loop body
LE: loop exit
PB: predicated region body
PF: predicated region fallthrough
CT: control target
= control target key end

     0   :  { %8 = vsyncpa [#allocation3], 0  ;;  %s1430_s0 = inlined_call_operand.vmem [shape: bf16[128,128], index: 0, kind: input, shape index: {}]   ;;  %s1431_s1 = inlined_call_operand.hbm [shape: bf16[128,256], index: 1, kind: input, shape index: {}]   ;;  %s1432_s2 = inlined_call_operand.hbm [shape: f32[1,256], index: 2, kind: input, shape index: {}]   ;;  %s1433_s3 = inlined_call_operand.vmem [shape: bf16[128,256], index: 3, kind: output, shape index: {}]  }
   0x1   :  { %10 = vsyncpa [#allocation3 + $0x1], 0 }
   0x2   :  { %11 = vsyncpa [#allocation5], 0 }
   0x3   :  { %13 = vsyncpa [#allocation5 + $0x1], 0  ;;  %s1227_s12 = smov 0   ;;  %s1229_s13 = smov 0  }
   0x4   :  { %s1231_s14 = smov 0   ;;  %s1233_s15 = smov 0  }
   0x5   :  { %s1235_s16 = smov 0   ;;  %s1237_s17 = smov 0  }
   0x6 LB: > { %s836_s18 = sadd.s32 4294967295, %s1200_s17   ;;  %s34_s19 = sadd.s32 1, %s1196_s16  ;;  %s1200_s17 = sphi %s1237_s17, %s19_s17   ;;  %s1196_s16 = sphi %s1235_s16, %s1443_s16   ;;  %s1192_s15 = sphi %s1233_s15, %s1442_s15   ;;  %s1188_s14 = sphi %s1231_s14, %s1441_s14   ;;  %s1184_s13 = sphi %s1229_s13, %s1440_s13   ;;  %s1180_s12 = sphi %s1227_s12, %s1439_s12  }
   0x7   : > { %p36_p0 = scmp.ge.s32.totalorder %s34_s19, 2  ;;  %s75_s20 = sadd.s32 1, %s1188_s14 }
   0x8   : > { %p82_p1 = scmp.ne.s32.totalorder %s1188_s14, %s1184_s13  ;;  %p83_p2 = scmp.eq.s32.totalorder %s1200_s17, 0 }
   0x9   : > { %s1445_s19 = smov (%p36_p0, %s34_s19), 0  ;;  %p88_p4 = scmp.ne.s32.totalorder %s1184_s13, %s1180_s12 }
   0xa   : > { %p1263_p3 = por %p83_p2, %p82_p1  ;;  %s71_s22 = ssub.s32 %s1196_s16, %s1445_s19 }
   0xb   : > { %p89_p5 = scmp.eq.s32.totalorder %s836_s18, 0  ;;  %p73_p6 = scmp.eq.s32.totalorder %s71_s22, 0 }
   0xc   : > { %p140_p7 = scmp.eq.s32.totalorder %s836_s18, 1  ;;  %p1022_p10 = scmp.lt.s32.totalorder %s1200_s17, 2 }
   0xd   : > { %p1270_p8 = por %p89_p5, %p88_p4  ;;  %s1283_s26 = sand.u32 1, %s1188_s14  }
   0xe   : > { %s1275_s24 = scalar_select %p73_p6, %s1188_s14, %s75_s20  }
   0xf   : > { %p1277_p9 = por %p140_p7, %p82_p1  ;;  %s842_s27 = sshll.u32 %s1196_s16, 6 }
  0x10   : > { %s841_s28 = sshll.u32 %s1283_s26, 6  ;;  %s190_s4 = scalar_lea.hbm %s1431_s1, %s842_s27 }
  0x11   : > { %s182_s5 = scalar_lea.vmem [#allocation2], %s841_s28  ;;  %p1292_p11 = pnand %p1022_p10, %p1263_p3 }
  0x12   : > { %s191_s6 = sshll.u32 %s182_s5, 4  ;;  %p844_p12 = scmp.ge.s32.totalorder %s1200_s17, 1  ;;  %s192_s6 = int_to_ptr.vmem [resolvable:$true] %s191_s6 }
  0x13   : > { %s179_s8 = scalar_lea.sflag [#allocation3], %s1283_s26  ;;  %p1092_p13 = pneg %p1292_p11 }
  0x14   : > { %s1103_s9 = scalar_lea.vmem %s192_s6, 1024  ;;  %s1202_s10 = smov [#allocation2]  }
  0x15   : > { %p1104_p0 = scmp.ne.s32.totalorder %s192_s6, %s1103_s9  ;;  %s1108_s11 = sshll.u32 %s1202_s10, 4  ;;  %s1109_s11 = int_to_ptr.vmem [resolvable:$false] %s1108_s11 }
  0x16   : > { %s1110_s12 = scalar_lea.vmem %s1109_s11, 2048  ;;  %p1111_p3 = scmp.lt.s32.totalorder %s192_s6, %s1109_s11 }
  0x17   : > { %p1106_p1 = pnand %p1104_p0, %p1092_p13  ;;  %p1112_p4 = scmp.lt.s32.totalorder %s1110_s12, %s1103_s9 }
  0x19   : > { %p1107_p2 = pneg %p1106_p1  ;;  %p1113_p5 = por %p1112_p4, %p1111_p3 }
  0x1b   : > { %p1114_p6 = pnand %p1113_p5, %p1107_p2 }
  0x1d   : > { %1117 = shalt.err (!%p1114_p6)
}
  0x1e   : > { %s1203_s18 = smov 128   ;;  %s1204_s20 = smov 64  }
  0x1f   : > { %s1205_s21 = smov 4   ;;  %p216_p7 = scmp.lt.s32.totalorder %s1200_s17, 3 }
  0x20   : > { %1018 = dma.hbm_to_vmem [thread:$0]  (!%p1292_p11), %s190_s4, 1024, %s192_s6, %s179_s8, %s1203_s18, %s1204_s20, %s1205_s21  }
  0x21   : > { %s843_s22 = sshll.u32 %s1196_s16, 4  ;;  %p1309_p10 = pnand %p844_p12, %p216_p7 }
  0x22   : > { %s209_s30 = scalar_lea.hbm %s1432_s2, %s843_s22  ;;  %s204_s5 = scalar_lea.vmem [#allocation4], %s1283_s26 }
  0x23   : > { %s211_s9 = sshll.u32 %s204_s5, 4  ;;  %s202_s10 = scalar_lea.sflag [#allocation5], %s1283_s26  ;;  %s212_s9 = int_to_ptr.vmem [resolvable:$true] %s211_s9 }
  0x24   : > { %s1131_s11 = scalar_lea.vmem %s212_s9, 16  ;;  %s1206_s4 = smov [#allocation4]  }
  0x25   : > { %p1132_p0 = scmp.ne.s32.totalorder %s212_s9, %s1131_s11  ;;  %s1136_s6 = sshll.u32 %s1206_s4, 4  ;;  %s1137_s6 = int_to_ptr.vmem [resolvable:$false] %s1136_s6 }
  0x26   : > { %s1138_s8 = scalar_lea.vmem %s1137_s6, 32  ;;  %p1139_p12 = scmp.lt.s32.totalorder %s212_s9, %s1137_s6 }
  0x27   : > { %p1134_p1 = pnand %p1132_p0, %p1092_p13  ;;  %p1140_p3 = scmp.lt.s32.totalorder %s1138_s8, %s1131_s11 }
  0x29   : > { %p1135_p2 = pneg %p1134_p1  ;;  %p1141_p4 = por %p1140_p3, %p1139_p12 }
  0x2b   : > { %p1142_p5 = pnand %p1141_p4, %p1135_p2 }
  0x2d   : > { %1145 = shalt.err (!%p1142_p5)
}
  0x2e   : > { %1021 = dma.hbm_to_vmem [thread:$0]  (!%p1292_p11), %s209_s30, 16, %s212_s9, %s202_s10  }
  0x2f   : > { %220 = sbr.rel (%p1309_p10) target bundleno = 312 (0x138), region = 32  ;;  %s1326_s26 = sand.u32 (!%p1309_p10), 1, %s1184_s13  }
  0x30   : > { %s845_s12 = sshll.u32 (!%p1309_p10), %s1326_s26, 6  ;;  %s223_s18 = scalar_lea.sflag (!%p1309_p10), [#allocation3], %s1326_s26 }
  0x31   : > { %s1332_s20 = scalar_lea.vmem (!%p1309_p10), [#allocation2], %s845_s12 }
  0x34   : > { %1171 = dma.done.wait (%p1270_p8), %s223_s18, 1024  }
  0x35   : > { %1173 = vsyncadd (%p1270_p8), %s223_s18, 4294966272  ;;  %s232_s7 = scalar_lea.sflag [#allocation5], %s1326_s26  ;;  %s234_s21 = scalar_lea.vmem [#allocation4], %s1326_s26 }
  0x36   : > { %1175 = dma.done.wait (%p1270_p8), %s232_s7, 16  }
  0x37   : > { %1177 = vsyncadd (%p1270_p8), %s232_s7, 4294967280  ;;  %v1074_v0 = vld [vmem:[%s1332_s20 + $0x38] sm:$0xff]   ;;  %v1075_v1 = vld [vmem:[%s1332_s20 + $0x30] sm:$0xff]   ;;  %s881_s26 = sshll.u32 (%p1277_p9), %s1192_s15, 2 }
  0x38   : > { %963 = vmatprep.subr.bf16.mxu0 %v1074_v0  ;;  %995 = vmatprep.subr.bf16.mxu1 %v1074_v0  ;;  %v1076_v2 = vld [vmem:[%s1332_s20 + $0x28] sm:$0xff]   ;;  %v1077_v3 = vld [vmem:[%s1332_s20 + $0x20] sm:$0xff]   ;;  %v1078_v6 = vld [vmem:[%s1332_s20 + $0x18] sm:$0xff]   ;;  %s619_s22 = scalar_lea.vmem (%p1277_p9), %s1433_s3, %s881_s26 }
  0x39   : > { %964 = vmatpush3.bf16.msra.mxu0 %v1074_v0  ;;  %1003 = vmatpush3.bf16.msra.mxu1 %v1074_v0  ;;  %v1082_v4 = vld [vmem:[%s1430_s0] sm:$0xff]   ;;  %v1079_v7 = vld [vmem:[%s1332_s20 + $0x10] sm:$0xff]   ;;  %v1080_v8 = vld [vmem:[%s1332_s20 + $0x8] sm:$0xff]  }
  0x3a   : > { %965 = vmatprep.subr.bf16.mxu0 %v1075_v1  ;;  %996 = vmatprep.subr.bf16.mxu1 %v1075_v1  ;;  %v1083_v5 = vld [vmem:[%s1430_s0 + $0x20] sm:$0xff]   ;;  %v1084_v10 = vld [vmem:[%s1430_s0 + $0x8] sm:$0xff]   ;;  %v1086_v12 = vld [vmem:[%s1430_s0 + $0x10] sm:$0xff]  }
  0x3b   : > { %979 = vmatprep.mubr.bf16.mxu0 %v1082_v4  ;;  %987 = vmatprep.mubr.bf16.mxu1 %v1083_v5  ;;  %v1081_v9 = vld [vmem:[%s1332_s20] sm:$0xff]   ;;  %v1085_v11 = vld [vmem:[%s1430_s0 + $0x28] sm:$0xff]   ;;  %v1087_v13 = vld [vmem:[%s1430_s0 + $0x30] sm:$0xff]  }
  0x3c   : > { %v1088_v14 = vld [vmem:[%s1430_s0 + $0x18] sm:$0xff]   ;;  %v847_v16 = vld [vmem:[%s234_s21] ss:$0 sm:$0xff]  ;;  %s1380_s21 = scalar_lea.vmem [#allocation6], %s845_s12 }
  0x3d   : > { %966 = vmatpush3.bf16.msra.mxu0 %v1075_v1  ;;  %1004 = vmatpush3.bf16.msra.mxu1 %v1075_v1  ;;  %v1089_v15 = vld [vmem:[%s1430_s0 + $0x38] sm:$0xff]  }
  0x3e   : > { %967 = vmatprep.subr.bf16.mxu0 %v1076_v2  ;;  %997 = vmatprep.subr.bf16.mxu1 %v1076_v2 }
  0x41   : > { %968 = vmatpush3.bf16.msra.mxu0 %v1076_v2  ;;  %1005 = vmatpush3.bf16.msra.mxu1 %v1076_v2 }
  0x42   : > { %969 = vmatprep.subr.bf16.mxu0 %v1077_v3  ;;  %998 = vmatprep.subr.bf16.mxu1 %v1077_v3 }
  0x45   : > { %970 = vmatpush3.bf16.msra.mxu0 %v1077_v3  ;;  %1006 = vmatpush3.bf16.msra.mxu1 %v1077_v3 }
  0x46   : > { %971 = vmatprep.subr.bf16.mxu0 %v1078_v6  ;;  %999 = vmatprep.subr.bf16.mxu1 %v1078_v6 }
  0x49   : > { %972 = vmatpush3.bf16.msra.mxu0 %v1078_v6  ;;  %1007 = vmatpush3.bf16.msra.mxu1 %v1078_v6 }
  0x4a   : > { %973 = vmatprep.subr.bf16.mxu0 %v1079_v7  ;;  %1000 = vmatprep.subr.bf16.mxu1 %v1079_v7 }
  0x4d   : > { %974 = vmatpush3.bf16.msra.mxu0 %v1079_v7  ;;  %1008 = vmatpush3.bf16.msra.mxu1 %v1079_v7 }
  0x4e   : > { %975 = vmatprep.subr.bf16.mxu0 %v1080_v8  ;;  %1001 = vmatprep.subr.bf16.mxu1 %v1080_v8 }
  0x51   : > { %976 = vmatpush3.bf16.msra.mxu0 %v1080_v8  ;;  %1009 = vmatpush3.bf16.msra.mxu1 %v1080_v8 }
  0x52   : > { %977 = vmatprep.subr.bf16.mxu0 %v1081_v9  ;;  %1002 = vmatprep.subr.bf16.mxu1 %v1081_v9 }
  0x55   : > { %978 = vmatpush3.bf16.msra.mxu0 %v1081_v9  ;;  %1010 = vmatpush3.bf16.msra.mxu1 %v1081_v9 }
  0x58   : > { %980 = vmatmul.mubr.bf16.vlgmr.msra.gmra.mxu0 %v1084_v10  ;;  %988 = vmatmul.mubr.bf16.vlgmr.msra.gmra.mxu1 %v1085_v11 }
  0x59   : > { %983 = vmatprep.mubr.bf16.mxu0 %v1086_v12  ;;  %991 = vmatprep.mubr.bf16.mxu1 %v1087_v13 }
  0x60   : > { %984 = vmatmul.mubr.bf16.gmra.mxu0 %v1088_v14  ;;  %992 = vmatmul.mubr.bf16.gmra.mxu1 %v1089_v15 }
 0x118   : > { %v981_v17 = vpop.f32.mrf.mxu0  ;;  %v989_v18 = vpop.f32.mrf.mxu1 }
 0x119   : > { %v458_v19 = vadd.f32 %v981_v17, %v847_v16  ;;  %v490_v20 = vadd.f32 %v989_v18, %v847_v16 }
 0x11a   : > { %v449_v21 = vpop.f32.mrf.mxu0  ;;  %v481_v22 = vpop.f32.mrf.mxu1 }
 0x11b   : > { %v450_v23 = vadd.f32 %v847_v16, %v449_v21  ;;  %v482_v24 = vadd.f32 %v847_v16, %v481_v22  ;;  %v514_v29 = vmax.f32 %v458_v19, 0.0  ;;  %v522_v30 = vmax.f32 %v490_v20, 0.0 }
 0x11c   : > { %v982_v25 = vpop.f32.mrf.mxu0  ;;  %v990_v26 = vpop.f32.mrf.mxu1 }
 0x11d   : > { %v461_v27 = vadd.f32 %v982_v25, %v847_v16  ;;  %v493_v28 = vadd.f32 %v990_v26, %v847_v16  ;;  %v512_v37 = vmax.f32 %v450_v23, 0.0  ;;  %v520_v38 = vmax.f32 %v482_v24, 0.0 }
 0x11e   : > { %v452_v31 = vpop.f32.mrf.mxu0  ;;  %v484_v32 = vpop.f32.mrf.mxu1 }
 0x11f   : > { %v515_v33 = vmax.f32 %v461_v27, 0.0  ;;  %v523_v34 = vmax.f32 %v493_v28, 0.0  ;;  %v453_v35 = vadd.f32 %v847_v16, %v452_v31  ;;  %v485_v36 = vadd.f32 %v847_v16, %v484_v32 }
 0x120   : > { %v985_v39 = vpop.f32.mrf.mxu0  ;;  %v993_v40 = vpop.f32.mrf.mxu1 }
 0x121   : > { %v908_v41 = vpack.c.bf16 %v515_v33, %v514_v29  ;;  %v928_v42 = vpack.c.bf16 %v523_v34, %v522_v30  ;;  %v513_v43 = vmax.f32 %v453_v35, 0.0  ;;  %v521_v44 = vmax.f32 %v485_v36, 0.0 }
 0x122   : > { %v474_v45 = vadd.f32 %v985_v39, %v847_v16  ;;  %v506_v46 = vadd.f32 %v993_v40, %v847_v16  ;;  %v465_v47 = vpop.f32.mrf.mxu0  ;;  %v497_v48 = vpop.f32.mrf.mxu1 }
 0x123   : > { %940 = vst [vmem:[%s1380_s21 + $0x8] sm:$0xff] %v908_v41   ;;  %944 = vst [vmem:[%s1380_s21 + $0x28] sm:$0xff] %v928_v42   ;;  %v903_v49 = vpack.c.bf16 %v513_v43, %v512_v37  ;;  %v923_v50 = vpack.c.bf16 %v521_v44, %v520_v38  ;;  %v466_v51 = vadd.f32 %v847_v16, %v465_v47 }
 0x124   : > { %v498_v52 = vadd.f32 %v847_v16, %v497_v48  ;;  %v986_v53 = vpop.f32.mrf.mxu0  ;;  %v994_v54 = vpop.f32.mrf.mxu1  ;;  %v518_v57 = vmax.f32 %v474_v45, 0.0  ;;  %v526_v58 = vmax.f32 %v506_v46, 0.0 }
 0x125   : > { %904 = vst [vmem:[%s1380_s21] sm:$0xff] %v903_v49   ;;  %943 = vst [vmem:[%s1380_s21 + $0x20] sm:$0xff] %v923_v50   ;;  %v477_v55 = vadd.f32 %v986_v53, %v847_v16  ;;  %v509_v56 = vadd.f32 %v994_v54, %v847_v16  ;;  %v516_v1 = vmax.f32 %v466_v51, 0.0 }
 0x126   : > { %v468_v59 = vpop.f32.mrf.mxu0  ;;  %v500_v60 = vpop.f32.mrf.mxu1  ;;  %v524_v2 = vmax.f32 %v498_v52, 0.0 }
 0x127   : > { %v519_v61 = vmax.f32 %v477_v55, 0.0  ;;  %v527_v62 = vmax.f32 %v509_v56, 0.0  ;;  %v469_v63 = vadd.f32 %v847_v16, %v468_v59  ;;  %v501_v0 = vadd.f32 %v847_v16, %v500_v60 }
 0x129   : > { %v918_v3 = vpack.c.bf16 %v519_v61, %v518_v57  ;;  %v938_v4 = vpack.c.bf16 %v527_v62, %v526_v58  ;;  %v517_v5 = vmax.f32 %v469_v63, 0.0  ;;  %v525_v6 = vmax.f32 %v501_v0, 0.0  ;;  %614 = sbr.rel (!%p1277_p9) target bundleno = 312 (0x138), region = 44 }
 0x12a   : > { %v640_v11 = vld [vmem:[%s1380_s21 + $0x8] sm:$0xf] (%p1277_p9)  ;;  %v642_v12 = vld [vmem:[%s1380_s21 + $0xc] sm:$0xf] (%p1277_p9) }
 0x12b   : > { %942 = vst [vmem:[%s1380_s21 + $0x18] sm:$0xff] %v918_v3   ;;  %946 = vst [vmem:[%s1380_s21 + $0x38] sm:$0xff] %v938_v4   ;;  %v913_v7 = vpack.c.bf16 %v517_v5, %v516_v1  ;;  %v933_v8 = vpack.c.bf16 %v525_v6, %v524_v2  ;;  %v656_v19 = vld [vmem:[%s1380_s21 + $0x28] sm:$0xf] (%p1277_p9)  ;;  %v658_v20 = vld [vmem:[%s1380_s21 + $0x2c] sm:$0xf] (%p1277_p9) }
 0x12c   : > { %v636_v9 = vld [vmem:[%s1380_s21] sm:$0xf] (%p1277_p9)  ;;  %v638_v10 = vld [vmem:[%s1380_s21 + $0x4] sm:$0xf] (%p1277_p9)  ;;  %641 = vst [vmem:[%s619_s22 + $0x10] sm:$0xf] (%p1277_p9), %v640_v11 }
 0x12d   : > { %941 = vst [vmem:[%s1380_s21 + $0x10] sm:$0xff] %v913_v7   ;;  %945 = vst [vmem:[%s1380_s21 + $0x30] sm:$0xff] %v933_v8   ;;  %v652_v17 = vld [vmem:[%s1380_s21 + $0x20] sm:$0xf] (%p1277_p9)  ;;  %v654_v18 = vld [vmem:[%s1380_s21 + $0x24] sm:$0xf] (%p1277_p9) }
 0x12e   : > { %637 = vst [vmem:[%s619_s22] sm:$0xf] %v636_v9  ;;  %639 = vst [vmem:[%s619_s22 + $0x8] sm:$0xf] %v638_v10 }
 0x12f   : > { %643 = vst [vmem:[%s619_s22 + $0x18] sm:$0xf] %v642_v12  ;;  %653 = vst [vmem:[%s619_s22 + $0x40] sm:$0xf] %v652_v17 }
 0x130   : > { %655 = vst [vmem:[%s619_s22 + $0x48] sm:$0xf] %v654_v18  ;;  %657 = vst [vmem:[%s619_s22 + $0x50] sm:$0xf] %v656_v19 }
 0x131   : > { %659 = vst [vmem:[%s619_s22 + $0x58] sm:$0xf] %v658_v20 }
 0x132   : > { %v648_v15 = vld [vmem:[%s1380_s21 + $0x18] sm:$0xf]  ;;  %v650_v16 = vld [vmem:[%s1380_s21 + $0x1c] sm:$0xf] }
 0x133   : > { %649 = vst [vmem:[%s619_s22 + $0x30] sm:$0xf] %v648_v15  ;;  %651 = vst [vmem:[%s619_s22 + $0x38] sm:$0xf] %v650_v16  ;;  %v664_v23 = vld [vmem:[%s1380_s21 + $0x38] sm:$0xf] }
 0x134   : > { %v644_v13 = vld [vmem:[%s1380_s21 + $0x10] sm:$0xf]  ;;  %v646_v14 = vld [vmem:[%s1380_s21 + $0x14] sm:$0xf]  ;;  %v666_v24 = vld [vmem:[%s1380_s21 + $0x3c] sm:$0xf] }
 0x135   : > { %645 = vst [vmem:[%s619_s22 + $0x20] sm:$0xf] %v644_v13  ;;  %647 = vst [vmem:[%s619_s22 + $0x28] sm:$0xf] %v646_v14  ;;  %v660_v21 = vld [vmem:[%s1380_s21 + $0x30] sm:$0xf] }
 0x136   : > { %v662_v22 = vld [vmem:[%s1380_s21 + $0x34] sm:$0xf]  ;;  %661 = vst [vmem:[%s619_s22 + $0x60] sm:$0xf] %v660_v21  ;;  %665 = vst [vmem:[%s619_s22 + $0x70] sm:$0xf] %v664_v23 }
 0x137   : > { %663 = vst [vmem:[%s619_s22 + $0x68] sm:$0xf] %v662_v22  ;;  %667 = vst [vmem:[%s619_s22 + $0x78] sm:$0xf] %v666_v24 }
 0x138 PF: > { %s19_s17 = sadd.s32 1, %s1200_s17   ;;  %s1439_s12 = smov %s1184_s13 }
 0x139   : > { %p16_p8 = scmp.ge.s32.totalorder %s19_s17, 4   ;;  %s1440_s13 = smov %s1188_s14 }
 0x13a   : > { %s1441_s14 = smov %s1275_s24  ;;  %s1442_s15 = smov %s1196_s16 }
 0x13b   : > { %s1443_s16 = smov %s1445_s19  ;;  %18 = sbr.rel (!%p16_p8) target bundleno = 6 (0x6), region = 129 }
 0x140   :  { %733 = vsyncpa [#allocation3], 1 }
 0x141   :  { %735 = vsyncpa [#allocation3 + $0x1], 1 }
 0x142   :  { %736 = vsyncpa [#allocation5], 1 }
 0x143   :  { %738 = vsyncpa [#allocation5 + $0x1], 1 }

// kernel: resnet_forward.5
= control target key start
LH: loop header
LB: loop body
LE: loop exit
PB: predicated region body
PF: predicated region fallthrough
CT: control target
= control target key end

     0   :  { %8 = vsyncpa [#allocation3], 0  ;;  %s1091_s0 = inlined_call_operand.vmem [shape: bf16[128,256], index: 0, kind: input, shape index: {}]   ;;  %s1092_s1 = inlined_call_operand.hbm [shape: bf16[256,128], index: 1, kind: input, shape index: {}]   ;;  %s1093_s2 = inlined_call_operand.hbm [shape: f32[1,128], index: 2, kind: input, shape index: {}]   ;;  %s1094_s3 = inlined_call_operand.vmem [shape: bf16[128,128], index: 3, kind: output, shape index: {}]  }
   0x1   :  { %9 = vsyncpa [#allocation5], 0  ;;  %s996_s12 = smov 0   ;;  %s998_s13 = smov 0  }
   0x2   :  { %s1000_s14 = smov 0  }
   0x3 LB: > { %s676_s15 = sadd.s32 4294967295, %s970_s14   ;;  %s34_s16 = sadd.s32 1, %s966_s13  ;;  %s970_s14 = sphi %s1000_s14, %s15_s14   ;;  %s966_s13 = sphi %s998_s13, %s1099_s13   ;;  %s962_s12 = sphi %s996_s12, %s1098_s12  }
   0x4   : > { %p36_p0 = scmp.ge.s32.totalorder %s34_s16, 2  ;;  %p678_p1 = scmp.ge.s32.totalorder %s970_s14, 1 }
   0x5   : > { %p149_p2 = scmp.lt.s32.totalorder %s970_s14, 3  ;;  %p1021_p4 = scmp.eq.s32.totalorder %s676_s15, 0 }
   0x6   : > { %s1101_s16 = smov (%p36_p0, %s34_s16), 0  ;;  %s972_s19 = smov [#allocation2]  }
   0x7   : > { %p1017_p3 = pnand %p678_p1, %p149_p2  ;;  %s165_s20 = sshll.u32 %s972_s19, 4  ;;  %s166_s20 = int_to_ptr.vmem [resolvable:$true] %s165_s20 }
   0x8   : > { %s973_s22 = smov [#allocation4]   ;;  %s899_s24 = scalar_lea.vmem %s166_s20, 2048 }
   0x9   : > { %p821_p5 = pneg %p1017_p3  ;;  %s181_s23 = sshll.u32 %s973_s22, 4  ;;  %s182_s23 = int_to_ptr.vmem [resolvable:$true] %s181_s23 }
   0xa   : > { %p900_p8 = scmp.ne.s32.totalorder %s166_s20, %s899_s24  ;;  %p907_p11 = scmp.lt.s32.totalorder %s166_s20, %s166_s20 }
   0xb   : > { %p1029_p6 = pnand %p1021_p4, %p821_p5  ;;  %p908_p12 = scmp.lt.s32.totalorder %s899_s24, %s899_s24 }
   0xd   : > { %p890_p7 = pneg %p1029_p6  ;;  %p909_p13 = por %p908_p12, %p907_p11 }
   0xf   : > { %p902_p9 = pnand %p900_p8, %p890_p7 }
  0x11   : > { %p903_p10 = pneg %p902_p9 }
  0x13   : > { %p910_p0 = pnand %p909_p13, %p903_p10 }
  0x15   : > { %913 = shalt.err (!%p910_p0)
}
  0x16   : > { %s974_s25 = smov 64   ;;  %s975_s26 = smov 4  }
  0x17   : > { %824 = dma.hbm_to_vmem [thread:$0]  (!%p1029_p6), %s1092_s1, 2048, %s166_s20, [#allocation3], %s974_s25, %s974_s25, %s975_s26  }
  0x18   : > { %s925_s29 = scalar_lea.vmem %s182_s23, 16  ;;  %s932_s30 = scalar_lea.vmem %s182_s23, 32 }
  0x19   : > { %p926_p1 = scmp.ne.s32.totalorder %s182_s23, %s925_s29  ;;  %p933_p8 = scmp.lt.s32.totalorder %s182_s23, %s182_s23 }
  0x1a   : > { %p934_p9 = scmp.lt.s32.totalorder %s932_s30, %s925_s29 }
  0x1b   : > { %p928_p2 = pnand %p926_p1, %p890_p7 }
  0x1c   : > { %p935_p10 = por %p934_p9, %p933_p8 }
  0x1d   : > { %p929_p5 = pneg %p928_p2 }
  0x1f   : > { %p936_p11 = pnand %p935_p10, %p929_p5 }
  0x21   : > { %939 = shalt.err (!%p936_p11)
}
  0x22   : > { %827 = dma.hbm_to_vmem [thread:$0]  (!%p1029_p6), %s1093_s2, 16, %s182_s23, [#allocation5]  }
  0x23   : > { %209 = sbr.rel (%p1017_p3) target bundleno = 292 (0x124), region = 32 }
  0x28   : > { %953 = dma.done.wait (%p1021_p4), [#allocation3], 2048  }
  0x29   : > { %955 = vsyncadd (%p1021_p4), [#allocation3], 4294965248 }
  0x2a   : > { %957 = dma.done.wait (%p1021_p4), [#allocation5], 16  }
  0x2b   : > { %959 = vsyncadd (%p1021_p4), [#allocation5], 4294967280  ;;  %v860_v0 = vld [vmem:[#allocation2 + $0x78] sm:$0xff]   ;;  %s685_s6 = sshll.u32 %s962_s12, 3  ;;  %v862_v2 = vld [vmem:[#allocation2 + $0x70] sm:$0xff]  }
  0x2c   : > { %v861_v1 = vld [vmem:[#allocation2 + $0x38] sm:$0xff]   ;;  %757 = vmatprep.subr.bf16.mxu0 %v860_v0  ;;  %797 = vmatprep.subr.bf16.mxu1 %v860_v0  ;;  %v863_v3 = vld [vmem:[#allocation2 + $0x30] sm:$0xff]   ;;  %p247_p3 = scmp.lt.s32.totalorder %s685_s6, 15  ;;  %v864_v4 = vld [vmem:[#allocation2 + $0x68] sm:$0xff]  }
  0x2d   : > { %758 = vmatpush3.bf16.msra.mxu0 %v861_v1  ;;  %805 = vmatpush3.bf16.msra.mxu1 %v861_v1  ;;  %v865_v5 = vld [vmem:[#allocation2 + $0x28] sm:$0xff]   ;;  %v866_v6 = vld [vmem:[#allocation2 + $0x60] sm:$0xff]   ;;  %v868_v8 = vld [vmem:[#allocation2 + $0x58] sm:$0xff]  }
  0x2e   : > { %759 = vmatprep.subr.bf16.mxu0 %v862_v2  ;;  %798 = vmatprep.subr.bf16.mxu1 %v862_v2  ;;  %s1103_s6 = smov (!%p247_p3, %s685_s6), 15  ;;  %v867_v7 = vld [vmem:[#allocation2 + $0x20] sm:$0xff]   ;;  %v869_v9 = vld [vmem:[#allocation2 + $0x18] sm:$0xff]   ;;  %v870_v10 = vld [vmem:[#allocation2 + $0x50] sm:$0xff]  }
  0x2f   : > { %s725_s7 = sshll.u32 %s1103_s6, 3  ;;  %v871_v13 = vld [vmem:[#allocation2 + $0x10] sm:$0xff]   ;;  %v872_v14 = vld [vmem:[#allocation2 + $0x48] sm:$0xff]   ;;  %v874_v16 = vld [vmem:[#allocation2 + $0x40] sm:$0xff]   ;;  %s689_s11 = sshll.u32 %s1103_s6, 2 }
  0x30   : > { %s1068_s10 = scalar_lea.vmem %s1091_s0, %s725_s7  ;;  %v873_v15 = vld [vmem:[#allocation2 + $0x8] sm:$0xff]   ;;  %v875_v17 = vld [vmem:[#allocation2] sm:$0xff]   ;;  %s265_s17 = scalar_lea.vmem %s1094_s3, %s689_s11 }
  0x31   : > { %760 = vmatpush3.bf16.msra.mxu0 %v863_v3  ;;  %806 = vmatpush3.bf16.msra.mxu1 %v863_v3  ;;  %v878_v11 = vld [vmem:[%s1068_s10 + $0x4] ss:$8 sps:$4 sm:$0xff]   ;;  %v876_v18 = vld [vmem:[%s1068_s10] ss:$8 sps:$4 sm:$0xff]   ;;  %v882_v20 = vld [vmem:[%s1068_s10 + $0x14] ss:$8 sps:$4 sm:$0xff]  }
  0x32   : > { %761 = vmatprep.subr.bf16.mxu0 %v864_v4  ;;  %799 = vmatprep.subr.bf16.mxu1 %v864_v4  ;;  %v881_v12 = vld [vmem:[%s1068_s10 + $0x24] ss:$8 sps:$4 sm:$0xff]   ;;  %v879_v19 = vld [vmem:[%s1068_s10 + $0x20] ss:$8 sps:$4 sm:$0xff]   ;;  %v884_v21 = vld [vmem:[%s1068_s10 + $0x34] ss:$8 sps:$4 sm:$0xff]  }
  0x33   : > { %483 = vmatprep.mubr.bf16.mxu0 %v878_v11  ;;  %499 = vmatprep.mubr.bf16.mxu1 %v881_v12  ;;  %v886_v22 = vld [vmem:[%s1068_s10 + $0x10] ss:$8 sps:$4 sm:$0xff]   ;;  %v690_v28 = vld [vmem:[#allocation4] ss:$0 sm:$0xff] }
  0x34   : > { %v887_v23 = vld [vmem:[%s1068_s10 + $0x30] ss:$8 sps:$4 sm:$0xff]  }
  0x35   : > { %762 = vmatpush3.bf16.msra.mxu0 %v865_v5  ;;  %807 = vmatpush3.bf16.msra.mxu1 %v865_v5 }
  0x36   : > { %763 = vmatprep.subr.bf16.mxu0 %v866_v6  ;;  %800 = vmatprep.subr.bf16.mxu1 %v866_v6 }
  0x39   : > { %764 = vmatpush3.bf16.msra.mxu0 %v867_v7  ;;  %808 = vmatpush3.bf16.msra.mxu1 %v867_v7 }
  0x3a   : > { %765 = vmatprep.subr.bf16.mxu0 %v868_v8  ;;  %801 = vmatprep.subr.bf16.mxu1 %v868_v8 }
  0x3d   : > { %766 = vmatpush3.bf16.msra.mxu0 %v869_v9  ;;  %809 = vmatpush3.bf16.msra.mxu1 %v869_v9 }
  0x3e   : > { %767 = vmatprep.subr.bf16.mxu0 %v870_v10  ;;  %802 = vmatprep.subr.bf16.mxu1 %v870_v10 }
  0x41   : > { %768 = vmatpush3.bf16.msra.mxu0 %v871_v13  ;;  %810 = vmatpush3.bf16.msra.mxu1 %v871_v13 }
  0x42   : > { %769 = vmatprep.subr.bf16.mxu0 %v872_v14  ;;  %803 = vmatprep.subr.bf16.mxu1 %v872_v14 }
  0x45   : > { %770 = vmatpush3.bf16.msra.mxu0 %v873_v15  ;;  %811 = vmatpush3.bf16.msra.mxu1 %v873_v15 }
  0x46   : > { %771 = vmatprep.subr.bf16.mxu0 %v874_v16  ;;  %804 = vmatprep.subr.bf16.mxu1 %v874_v16 }
  0x49   : > { %772 = vmatpush3.bf16.msra.mxu0 %v875_v17  ;;  %812 = vmatpush3.bf16.msra.mxu1 %v875_v17 }
  0x4c   : > { %484 = vmatmul.mubr.bf16.vlgmr.msra.gmra.mxu0 %v876_v18  ;;  %500 = vmatmul.mubr.bf16.vlgmr.msra.gmra.mxu1 %v879_v19 }
  0x4d   : > { %491 = vmatprep.mubr.bf16.mxu0 %v882_v20  ;;  %507 = vmatprep.mubr.bf16.mxu1 %v884_v21 }
  0x54   : > { %492 = vmatmul.mubr.bf16.gmra.mxu0 %v886_v22  ;;  %508 = vmatmul.mubr.bf16.gmra.mxu1 %v887_v23 }
 0x10c   : > { %v773_v24 = vpop.f32.mrf.mxu0  ;;  %v785_v25 = vpop.f32.mrf.mxu1 }
 0x10e   : > { %v774_v26 = vpop.f32.mrf.mxu0  ;;  %v786_v27 = vpop.f32.mrf.mxu1 }
 0x10f   : > { %v775_v29 = vadd.f32 %v774_v26, %v773_v24  ;;  %v787_v30 = vadd.f32 %v786_v27, %v785_v25 }
 0x110   : > { %v776_v31 = vpop.f32.mrf.mxu0  ;;  %v788_v32 = vpop.f32.mrf.mxu1 }
 0x111   : > { %v486_v33 = vadd.f32 %v775_v29, %v690_v28  ;;  %v502_v34 = vadd.f32 %v787_v30, %v690_v28 }
 0x112   : > { %v777_v35 = vpop.f32.mrf.mxu0  ;;  %v789_v36 = vpop.f32.mrf.mxu1 }
 0x113   : > { %v778_v37 = vadd.f32 %v777_v35, %v776_v31  ;;  %v790_v38 = vadd.f32 %v789_v36, %v788_v32  ;;  %v516_v43 = vmax.f32 %v486_v33, 0.0  ;;  %v520_v44 = vmax.f32 %v502_v34, 0.0 }
 0x114   : > { %v779_v39 = vpop.f32.mrf.mxu0  ;;  %v791_v40 = vpop.f32.mrf.mxu1 }
 0x115   : > { %v489_v41 = vadd.f32 %v778_v37, %v690_v28  ;;  %v505_v42 = vadd.f32 %v790_v38, %v690_v28 }
 0x116   : > { %v780_v45 = vpop.f32.mrf.mxu0  ;;  %v792_v46 = vpop.f32.mrf.mxu1 }
 0x117   : > { %v517_v47 = vmax.f32 %v489_v41, 0.0  ;;  %v521_v48 = vmax.f32 %v505_v42, 0.0  ;;  %v781_v49 = vadd.f32 %v780_v45, %v779_v39  ;;  %v793_v50 = vadd.f32 %v792_v46, %v791_v40 }
 0x118   : > { %v782_v51 = vpop.f32.mrf.mxu0  ;;  %v794_v52 = vpop.f32.mrf.mxu1 }
 0x119   : > { %v737_v53 = vpack.c.bf16 %v517_v47, %v516_v43  ;;  %v747_v54 = vpack.c.bf16 %v521_v48, %v520_v44  ;;  %v494_v57 = vadd.f32 %v781_v49, %v690_v28  ;;  %v510_v58 = vadd.f32 %v793_v50, %v690_v28 }
 0x11a   : > { %v783_v55 = vpop.f32.mrf.mxu0  ;;  %v795_v56 = vpop.f32.mrf.mxu1 }
 0x11b   : > { %738 = vst [vmem:[%s265_s17] sm:$0xff] %v737_v53   ;;  %755 = vst [vmem:[%s265_s17 + $0x10] sm:$0xff] %v747_v54   ;;  %v784_v59 = vadd.f32 %v783_v55, %v782_v51  ;;  %v796_v60 = vadd.f32 %v795_v56, %v794_v52  ;;  %v518_v63 = vmax.f32 %v494_v57, 0.0  ;;  %v522_v0 = vmax.f32 %v510_v58, 0.0 }
 0x11d   : > { %v497_v61 = vadd.f32 %v784_v59, %v690_v28  ;;  %v513_v62 = vadd.f32 %v796_v60, %v690_v28 }
 0x11f   : > { %v519_v1 = vmax.f32 %v497_v61, 0.0  ;;  %v523_v2 = vmax.f32 %v513_v62, 0.0 }
 0x121   : > { %v742_v3 = vpack.c.bf16 %v519_v1, %v518_v63  ;;  %v752_v4 = vpack.c.bf16 %v523_v2, %v522_v0 }
 0x123   : > { %754 = vst [vmem:[%s265_s17 + $0x8] sm:$0xff] %v742_v3   ;;  %756 = vst [vmem:[%s265_s17 + $0x18] sm:$0xff] %v752_v4  }
 0x124 PF: > { %s15_s14 = sadd.s32 1, %s970_s14   ;;  %s1098_s12 = smov %s966_s13 }
 0x125   : > { %p12_p4 = scmp.ge.s32.totalorder %s15_s14, 4   ;;  %s1099_s13 = smov %s1101_s16 }
 0x127   :  { %14 = sbr.rel (!%p12_p4) target bundleno = 3 (0x3), region = 73 }
 0x12c   :  { %592 = vsyncpa [#allocation3], 1 }
 0x12d   :  { %594 = vsyncpa [#allocation3 + $0x1], 1 }
 0x12e   :  { %595 = vsyncpa [#allocation5], 1 }

</bundles_post_ra>
